<compile_context>
chip_gen: v7x
topology: tpu7x:2x2x1
jax: 0.10.0
libtpu: 0.0.40
codegen_flags: <defaults>
</compile_context>

<pallas_src>
import numpy as np
import jax
import jax.numpy as jnp
from jax.experimental import pallas as pl
from jax.experimental.pallas import tpu as pltpu


_LANES = 128


def _select_kernel(r_ref, x_ref, c_ref, o_ref):
    # r_ref: (out_h, H)        row selection (upsample + reflect), one-hot
    # x_ref: (B, H, W)         block of B (n, c) slabs of x2
    # c_ref: (W, Wo_pad)       column selection, one-hot, zero-padded to 128*k lanes
    # o_ref: (B, out_h, Wo_pad)
    r = r_ref[...]
    c = c_ref[...]
    for b in range(x_ref.shape[0]):            # static unroll over the channel block
        rows = jnp.dot(r, x_ref[b], preferred_element_type=jnp.float32)
        o_ref[b] = jnp.dot(rows, c,
                           preferred_element_type=jnp.float32).astype(o_ref.dtype)


def _reflect_index(k, L):
    # PyTorch ReflectionPad2d index rule (no border repeat); requires pad < L.
    if k < 0:
        k = -k
    if k >= L:
        k = 2 * (L - 1) - k
    return k


def _build_selection_matrices(H_in, W_in, out_h, out_w, wo_pad, top, left):
    """One-hot matrices encoding reflection_pad(nearest_2x_upsample(x))."""
    H_up, W_up = 2 * H_in, 2 * W_in
    R = np.zeros((out_h, H_in), np.float32)
    for i in range(out_h):
        R[i, _reflect_index(i - top, H_up) // 2] = 1.0
    Ct = np.zeros((W_in, wo_pad), np.float32)   # extra columns stay 0 -> cropped later
    for j in range(out_w):
        Ct[_reflect_index(j - left, W_up) // 2, j] = 1.0
    return R, Ct


def _pick_channel_block(nc, h, w, out_h, wo_pad, itemsize):
    """Channels per grid step: amortize per-step overhead, stay VMEM-safe."""
    h_p = -(-h // 8) * 8
    w_p = -(-w // _LANES) * _LANES
    oh_p = -(-out_h // 8) * 8
    per_chan = 2 * (h_p * w_p + oh_p * wo_pad) * itemsize   # double-buffered in+out
    budget = 8 * 1024 * 1024   # conservative; fits default scoped VMEM on v5e/v6e/v7x
    b = max(1, min(32, budget // max(per_chan, 1)))
    if nc >= 2:
        b = min(b, (nc + 1) // 2)   # keep >= 2 grid steps (v7x has 2 TensorCores)
    return int(min(b, nc))


def upsample_forward(x1, x2, is_testing):
    """Equivalent of Upsample(Is_testing).forward(x1, x2, Is_testing)."""
    N, C, H, W = x2.shape
    H_up, W_up = 2 * H, 2 * W
    if is_testing:
        H1, W1 = int(x1.shape[2]), int(x1.shape[3])
        dh, dw = H1 - H_up, W1 - W_up
        if dh < 0 or dw < 0:
            # TODO(synk): negative (cropping) pads are not supported.
            raise ValueError("x1 spatial size must be >= 2x x2 spatial size")
        # PyTorch code's `% 2 is 0.0` is always False -> left=int(d/2), right=d-left.
        top = int(dh / 2) if dh != 0 else 0
        left = int(dw / 2) if dw != 0 else 0
        if max(top, dh - top) >= H_up or max(left, dw - left) >= W_up:
            raise ValueError("ReflectionPad2d requires pad < upsampled dimension")
        out_h, out_w = H1, W1
    else:
        top = left = 0
        out_h, out_w = H_up, W_up

    wo_pad = max(_LANES, -(-out_w // _LANES) * _LANES)   # lane-dense output width
    R, Ct = _build_selection_matrices(H, W, out_h, out_w, wo_pad, top, left)
    # 0/1 selection coefficients are exact in bf16/f32 -> keep the data's dtype.
    R = jnp.asarray(R, dtype=x2.dtype)
    Ct = jnp.asarray(Ct, dtype=x2.dtype)

    nc = N * C
    B = _pick_channel_block(nc, H, W, out_h, wo_pad, jnp.dtype(x2.dtype).itemsize)
    grid = -(-nc // B)
    nc_pad = grid * B

    x_flat = x2.reshape(nc, H, W)
    if nc_pad != nc:
        x_flat = jnp.concatenate(
            [x_flat, jnp.zeros((nc_pad - nc, H, W), x2.dtype)], axis=0)

    out = pl.pallas_call(
        _select_kernel,
        out_shape=jax.ShapeDtypeStruct((nc_pad, out_h, wo_pad), x2.dtype),
        grid_spec=pltpu.PrefetchScalarGridSpec(
            num_scalar_prefetch=0,
            grid=(grid,),
            in_specs=[
                pl.BlockSpec((out_h, H), lambda i: (0, 0)),
                pl.BlockSpec((B, H, W), lambda i: (i, 0, 0)),
                pl.BlockSpec((W, wo_pad), lambda i: (0, 0)),
            ],
            out_specs=pl.BlockSpec((B, out_h, wo_pad), lambda i: (i, 0, 0)),
        ),
        compiler_params=pltpu.CompilerParams(
            dimension_semantics=("parallel",)),
    )(R, x_flat, Ct)

    return out[:nc, :, :out_w].reshape(N, C, out_h, out_w)


def _ref_forward(x1, x2, is_testing):
    """Pure-jnp reference for correctness checking."""
    up = jnp.repeat(jnp.repeat(x2, 2, axis=2), 2, axis=3)
    if not is_testing:
        return up
    H1, W1 = x1.shape[2], x1.shape[3]
    dh = H1 - up.shape[2]
    dw = W1 - up.shape[3]
    top = int(dh / 2) if dh != 0 else 0
    left = int(dw / 2) if dw != 0 else 0
    return jnp.pad(up, ((0, 0), (0, 0), (top, dh - top), (left, dw - left)),
                   mode="reflect")


if __name__ == "__main__":
    key = jax.random.PRNGKey(0)
    k1, k2 = jax.random.split(key)
    # x2 is the tensor being upsampled; x1 only supplies the target shape.
    x2 = jax.random.normal(k1, (2, 4, 8, 8), dtype=jnp.float32)
    x1 = jax.random.normal(k2, (2, 4, 17, 18), dtype=jnp.float32)

    # Is_testing = True: upsample + (odd) reflection pad to x1's spatial shape.
    out = upsample_forward(x1, x2, True)
    jax.block_until_ready(out)
    ref = _ref_forward(x1, x2, True)
    assert out.shape == ref.shape, (out.shape, ref.shape)
    assert jnp.allclose(out, ref, atol=1e-6), "mismatch (testing=True, odd pad)"

    # Is_testing = True with even pads.
    x1e = jax.random.normal(k2, (2, 4, 20, 22), dtype=jnp.float32)
    out_e = upsample_forward(x1e, x2, True)
    jax.block_until_ready(out_e)
    ref_e = _ref_forward(x1e, x2, True)
    assert out_e.shape == ref_e.shape
    assert jnp.allclose(out_e, ref_e, atol=1e-6), "mismatch (testing=True, even pad)"

    # Is_testing = False: plain nearest 2x upsample.
    out2 = upsample_forward(x1, x2, False)
    jax.block_until_ready(out2)
    ref2 = _ref_forward(x1, x2, False)
    assert out2.shape == ref2.shape
    assert jnp.allclose(out2, ref2, atol=1e-6), "mismatch (testing=False)"

    print("KERNEL_OK")
</pallas_src>

<mosaic_0001>
module attributes {stable_mosaic.version = 11 : i64} {
  func.func @_select_kernel(%arg0: i32, %arg1: memref<17x8xf32, #tpu.memory_space<vmem>>, %arg2: memref<4x8x8xf32, #tpu.memory_space<vmem>>, %arg3: memref<8x128xf32, #tpu.memory_space<vmem>>, %arg4: memref<4x17x128xf32, #tpu.memory_space<vmem>>) attributes {dimension_semantics = [#tpu.dimension_semantics<parallel>], iteration_bounds = array<i64: 2>, scalar_prefetch = 0 : i64, scratch_operands = 0 : i64, tpu.core_type = #tpu.core_type<tc>, window_params = [{pipeline_mode = #tpu.pipeline_mode<synchronous>, transform_indices = @transform_0, window_bounds = array<i64: 17, 8>}, {transform_indices = @transform_1, window_bounds = array<i64: 4, 8, 8>}, {pipeline_mode = #tpu.pipeline_mode<synchronous>, transform_indices = @transform_2, window_bounds = array<i64: 8, 128>}, {transform_indices = @transform_3, window_bounds = array<i64: 4, 17, 128>}]} {
    %c0 = arith.constant 0 : index
    %c0_0 = arith.constant 0 : index
    %0 = vector.load %arg1[%c0, %c0_0] : memref<17x8xf32, #tpu.memory_space<vmem>>, vector<17x8xf32>
    %c0_1 = arith.constant 0 : index
    %c0_2 = arith.constant 0 : index
    %1 = vector.load %arg3[%c0_1, %c0_2] : memref<8x128xf32, #tpu.memory_space<vmem>>, vector<8x128xf32>
    %c0_3 = arith.constant 0 : index
    %c0_4 = arith.constant 0 : index
    %c0_5 = arith.constant 0 : index
    %2 = vector.load %arg2[%c0_3, %c0_4, %c0_5] : memref<4x8x8xf32, #tpu.memory_space<vmem>>, vector<1x8x8xf32>
    %3 = vector.shape_cast %2 : vector<1x8x8xf32> to vector<8x8xf32>
    %cst = arith.constant dense<0.000000e+00> : vector<17x8xf32>
    %4 = tpu.matmul %0, %3, %cst {dimension_numbers = #tpu.dot_dimension_numbers<[1], [0], [0], [1], [0, 0, 1, 1], [], []>} : vector<17x8xf32>, vector<8x8xf32>, vector<17x8xf32> -> vector<17x8xf32>
    %cst_6 = arith.constant dense<0.000000e+00> : vector<17x128xf32>
    %5 = tpu.matmul %4, %1, %cst_6 {dimension_numbers = #tpu.dot_dimension_numbers<[1], [0], [0], [1], [0, 0, 1, 1], [], []>} : vector<17x8xf32>, vector<8x128xf32>, vector<17x128xf32> -> vector<17x128xf32>
    %c0_7 = arith.constant 0 : index
    %c0_8 = arith.constant 0 : index
    %c0_9 = arith.constant 0 : index
    %6 = vector.load %arg4[%c0_7, %c0_8, %c0_9] : memref<4x17x128xf32, #tpu.memory_space<vmem>>, vector<1x17x128xf32>
    %7 = vector.shape_cast %6 : vector<1x17x128xf32> to vector<17x128xf32>
    %8 = vector.shape_cast %5 : vector<17x128xf32> to vector<1x17x128xf32>
    tpu.vector_store %arg4[%c0_7, %c0_8, %c0_9], %8 {strides = array<i32>} : memref<4x17x128xf32, #tpu.memory_space<vmem>>, vector<1x17x128xf32>,
    %c1 = arith.constant 1 : index
    %c0_10 = arith.constant 0 : index
    %c0_11 = arith.constant 0 : index
    %9 = vector.load %arg2[%c1, %c0_10, %c0_11] : memref<4x8x8xf32, #tpu.memory_space<vmem>>, vector<1x8x8xf32>
    %10 = vector.shape_cast %9 : vector<1x8x8xf32> to vector<8x8xf32>
    %cst_12 = arith.constant dense<0.000000e+00> : vector<17x8xf32>
    %11 = tpu.matmul %0, %10, %cst_12 {dimension_numbers = #tpu.dot_dimension_numbers<[1], [0], [0], [1], [0, 0, 1, 1], [], []>} : vector<17x8xf32>, vector<8x8xf32>, vector<17x8xf32> -> vector<17x8xf32>
    %cst_13 = arith.constant dense<0.000000e+00> : vector<17x128xf32>
    %12 = tpu.matmul %11, %1, %cst_13 {dimension_numbers = #tpu.dot_dimension_numbers<[1], [0], [0], [1], [0, 0, 1, 1], [], []>} : vector<17x8xf32>, vector<8x128xf32>, vector<17x128xf32> -> vector<17x128xf32>
    %c1_14 = arith.constant 1 : index
    %c0_15 = arith.constant 0 : index
    %c0_16 = arith.constant 0 : index
    %13 = vector.load %arg4[%c1_14, %c0_15, %c0_16] : memref<4x17x128xf32, #tpu.memory_space<vmem>>, vector<1x17x128xf32>
    %14 = vector.shape_cast %13 : vector<1x17x128xf32> to vector<17x128xf32>
    %15 = vector.shape_cast %12 : vector<17x128xf32> to vector<1x17x128xf32>
    tpu.vector_store %arg4[%c1_14, %c0_15, %c0_16], %15 {strides = array<i32>} : memref<4x17x128xf32, #tpu.memory_space<vmem>>, vector<1x17x128xf32>,
    %c2 = arith.constant 2 : index
    %c0_17 = arith.constant 0 : index
    %c0_18 = arith.constant 0 : index
    %16 = vector.load %arg2[%c2, %c0_17, %c0_18] : memref<4x8x8xf32, #tpu.memory_space<vmem>>, vector<1x8x8xf32>
    %17 = vector.shape_cast %16 : vector<1x8x8xf32> to vector<8x8xf32>
    %cst_19 = arith.constant dense<0.000000e+00> : vector<17x8xf32>
    %18 = tpu.matmul %0, %17, %cst_19 {dimension_numbers = #tpu.dot_dimension_numbers<[1], [0], [0], [1], [0, 0, 1, 1], [], []>} : vector<17x8xf32>, vector<8x8xf32>, vector<17x8xf32> -> vector<17x8xf32>
    %cst_20 = arith.constant dense<0.000000e+00> : vector<17x128xf32>
    %19 = tpu.matmul %18, %1, %cst_20 {dimension_numbers = #tpu.dot_dimension_numbers<[1], [0], [0], [1], [0, 0, 1, 1], [], []>} : vector<17x8xf32>, vector<8x128xf32>, vector<17x128xf32> -> vector<17x128xf32>
    %c2_21 = arith.constant 2 : index
    %c0_22 = arith.constant 0 : index
    %c0_23 = arith.constant 0 : index
    %20 = vector.load %arg4[%c2_21, %c0_22, %c0_23] : memref<4x17x128xf32, #tpu.memory_space<vmem>>, vector<1x17x128xf32>
    %21 = vector.shape_cast %20 : vector<1x17x128xf32> to vector<17x128xf32>
    %22 = vector.shape_cast %19 : vector<17x128xf32> to vector<1x17x128xf32>
    tpu.vector_store %arg4[%c2_21, %c0_22, %c0_23], %22 {strides = array<i32>} : memref<4x17x128xf32, #tpu.memory_space<vmem>>, vector<1x17x128xf32>,
    %c3 = arith.constant 3 : index
    %c0_24 = arith.constant 0 : index
    %c0_25 = arith.constant 0 : index
    %23 = vector.load %arg2[%c3, %c0_24, %c0_25] : memref<4x8x8xf32, #tpu.memory_space<vmem>>, vector<1x8x8xf32>
    %24 = vector.shape_cast %23 : vector<1x8x8xf32> to vector<8x8xf32>
    %cst_26 = arith.constant dense<0.000000e+00> : vector<17x8xf32>
    %25 = tpu.matmul %0, %24, %cst_26 {dimension_numbers = #tpu.dot_dimension_numbers<[1], [0], [0], [1], [0, 0, 1, 1], [], []>} : vector<17x8xf32>, vector<8x8xf32>, vector<17x8xf32> -> vector<17x8xf32>
    %cst_27 = arith.constant dense<0.000000e+00> : vector<17x128xf32>
    %26 = tpu.matmul %25, %1, %cst_27 {dimension_numbers = #tpu.dot_dimension_numbers<[1], [0], [0], [1], [0, 0, 1, 1], [], []>} : vector<17x8xf32>, vector<8x128xf32>, vector<17x128xf32> -> vector<17x128xf32>
    %c3_28 = arith.constant 3 : index
    %c0_29 = arith.constant 0 : index
    %c0_30 = arith.constant 0 : index
    %27 = vector.load %arg4[%c3_28, %c0_29, %c0_30] : memref<4x17x128xf32, #tpu.memory_space<vmem>>, vector<1x17x128xf32>
    %28 = vector.shape_cast %27 : vector<1x17x128xf32> to vector<17x128xf32>
    %29 = vector.shape_cast %26 : vector<17x128xf32> to vector<1x17x128xf32>
    tpu.vector_store %arg4[%c3_28, %c0_29, %c0_30], %29 {strides = array<i32>} : memref<4x17x128xf32, #tpu.memory_space<vmem>>, vector<1x17x128xf32>,
    return
  }
  func.func @transform_0(%arg0: i32) -> (i32, i32) {
    %c0_i32 = arith.constant 0 : i32
    %c0_i32_0 = arith.constant 0 : i32
    %c0_i32_1 = arith.constant 0 : i32
    return %c0_i32, %c0_i32_0 : i32, i32
  }
  func.func @transform_1(%arg0: i32) -> (i32, i32, i32) {
    %c0_i32 = arith.constant 0 : i32
    %c0_i32_0 = arith.constant 0 : i32
    %c0_i32_1 = arith.constant 0 : i32
    return %arg0, %c0_i32, %c0_i32_0 : i32, i32, i32
  }
  func.func @transform_2(%arg0: i32) -> (i32, i32) {
    %c0_i32 = arith.constant 0 : i32
    %c0_i32_0 = arith.constant 0 : i32
    %c0_i32_1 = arith.constant 0 : i32
    return %c0_i32, %c0_i32_0 : i32, i32
  }
  func.func @transform_3(%arg0: i32) -> (i32, i32, i32) {
    %c0_i32 = arith.constant 0 : i32
    %c0_i32_0 = arith.constant 0 : i32
    %c0_i32_1 = arith.constant 0 : i32
    return %arg0, %c0_i32, %c0_i32_0 : i32, i32, i32
  }
}

</mosaic_0001>

<bundles_post_ra>
// kernel: tpu_custom_call.1
= control target key start
LH: loop header
LB: loop body
LE: loop exit
PB: predicated region body
PF: predicated region fallthrough
CT: control target
= control target key end

     0   :  { %8 = vsyncpa [#allocation3], 0  ;;  %s1500_s0 = inlined_call_operand.vmem [shape: f32[17,8], index: 0, kind: input, shape index: {}]   ;;  %s1501_s1 = inlined_call_operand.hbm [shape: f32[8,8,8], index: 1, kind: input, shape index: {}]   ;;  %s1502_s2 = inlined_call_operand.vmem [shape: f32[8,128], index: 2, kind: input, shape index: {}]   ;;  %s1503_s3 = inlined_call_operand.vmem [shape: f32[8,17,128], index: 3, kind: output, shape index: {}]  }
   0x1   :  { %10 = vsyncpa [#allocation3 + $0x1], 0  ;;  %s1281_s12 = smov 0   ;;  %s1283_s13 = smov 0  }
   0x2   :  { %s1285_s14 = smov 0   ;;  %s1287_s15 = smov 0  }
   0x3 LB: > { %s976_s16 = sadd.s32 4294967295, %s1254_s15   ;;  %s1301_s17 = sadd.s32 1, %s1254_s15   ;;  %s1254_s15 = sphi %s1287_s15, %s1510_s15   ;;  %s1250_s14 = sphi %s1285_s14, %s1509_s14   ;;  %s1246_s13 = sphi %s1283_s13, %s1508_s13   ;;  %s1242_s12 = sphi %s1281_s12, %s1507_s12  }
   0x4   : > { %s41_s18 = ssub.s32 %s1254_s15, %s1301_s17  ;;  %s44_s19 = sadd.s32 1, %s1250_s14 }
   0x5   : > { %p42_p0 = scmp.eq.s32.totalorder %s41_s18, 0  ;;  %p51_p1 = scmp.ne.s32.totalorder %s1250_s14, %s1246_s13 }
   0x6   : > { %p52_p2 = scmp.eq.s32.totalorder %s1254_s15, 0  ;;  %p57_p3 = scmp.ne.s32.totalorder %s1246_s13, %s1242_s12 }
   0x7   : > { %s1311_s20 = scalar_select %p42_p0, %s1250_s14, %s44_s19  }
   0x8   : > { %p53_p4 = por %p52_p2, %p51_p1  ;;  %p58_p5 = scmp.eq.s32.totalorder %s976_s16, 0 }
   0x9   : > { %p1153_p6 = scmp.lt.s32.totalorder %s1254_s15, 2  ;;  %s134_s22 = sand.u32 1, %s1250_s14  }
   0xa   : > { %p1316_p7 = por %p58_p5, %p57_p3  ;;  %s980_s23 = sshll.u32 %s134_s22, 5 }
   0xb   : > { %s1025_s24 = sshll.u32 %s1254_s15, 9  ;;  %s138_s28 = scalar_lea.vmem [#allocation2], %s980_s23 }
   0xc   : > { %s1325_s27 = scalar_lea.hbm %s1501_s1, %s1025_s24  ;;  %s145_s29 = sshll.u32 %s138_s28, 4  ;;  %s1327_s29 = int_to_ptr.vmem [resolvable:$true] %s145_s29 }
   0xd   : > { %p1329_p8 = pnand %p1153_p6, %p53_p4  ;;  %s1334_s4 = scalar_lea.sflag [#allocation3], %s134_s22 }
   0xe   : > { %s1190_s5 = scalar_lea.hbm %s1325_s27, 512  ;;  %s1195_s8 = scalar_lea.hbm %s1501_s1, 1024 }
   0xf   : > { %p1191_p10 = scmp.ne.s32.totalorder %s1325_s27, %s1190_s5  ;;  %p1192_p11 = pneg %p1329_p8 }
  0x10   : > { %p1196_p0 = scmp.lt.u32.totalorder %s1325_s27, %s1501_s1  ;;  %p1197_p1 = scmp.lt.u32.totalorder %s1195_s8, %s1190_s5 }
  0x11   : > { %p1193_p12 = pnand %p1192_p11, %p1191_p10  ;;  %p1199_p3 = scmp.lt.u32.totalorder %s1190_s5, %s1325_s27 }
  0x12   : > { %p1198_p2 = por %p1197_p1, %p1196_p0 }
  0x13   : > { %p1194_p13 = pneg %p1193_p12 }
  0x14   : > { %p1200_p4 = por %p1199_p3, %p1198_p2 }
  0x16   : > { %p1201_p5 = pnand %p1200_p4, %p1194_p13 }
  0x18   : > { %1204 = shalt.err (!%p1201_p5)
}
  0x19   : > { %s1205_s11 = scalar_lea.vmem %s1327_s29, 512  ;;  %s1256_s12 = smov [#allocation2]  }
  0x1a   : > { %p1206_p6 = scmp.ne.s32.totalorder %s1327_s29, %s1205_s11  ;;  %s1210_s18 = sshll.u32 %s1256_s12, 4  ;;  %s1211_s18 = int_to_ptr.vmem [resolvable:$false] %s1210_s18 }
  0x1b   : > { %s1212_s19 = scalar_lea.vmem %s1211_s18, 1024  ;;  %p1213_p9 = scmp.lt.s32.totalorder %s1327_s29, %s1211_s18 }
  0x1c   : > { %p1208_p10 = pnand %p1206_p6, %p1192_p11  ;;  %p1214_p0 = scmp.lt.s32.totalorder %s1212_s19, %s1205_s11 }
  0x1e   : > { %p1209_p12 = pneg %p1208_p10  ;;  %p1215_p1 = por %p1214_p0, %p1213_p9 }
  0x20   : > { %p1216_p2 = pnand %p1215_p1, %p1209_p12 }
  0x22   : > { %1219 = shalt.err (!%p1216_p2)
}
  0x23   : > { %s1257_s22 = smov 128   ;;  %s1258_s23 = smov 8  }
  0x24   : > { %1152 = dma.hbm_to_vmem [thread:$0]  (!%p1329_p8), %s1325_s27, 512, %s1327_s29, %s1334_s4, %s1257_s22, %s1257_s22, %s1258_s23  }
  0x25   : > { %p153_p11 = scmp.lt.s32.totalorder %s1254_s15, 3  ;;  %p1506_p13 = scmp.ge.s32.totalorder %s1254_s15, 1 }
  0x27   : > { %p154_p3 = pnand %p1506_p13, %p153_p11 }
  0x28   : > { %s159_s24 = sand.u32 (!%p154_p3), 1, %s1246_s13  }
  0x29   : > { %157 = sbr.rel (%p154_p3) target bundleno = 522 (0x20a), region = 32  ;;  %s984_s25 = sshll.u32 (!%p154_p3), %s159_s24, 5 }
  0x2a   : > { %s160_s26 = scalar_lea.sflag (!%p154_p3), [#allocation3], %s159_s24  ;;  %s1366_s28 = scalar_lea.vmem (!%p154_p3), [#allocation2], %s984_s25 }
  0x30   : > { %1237 = dma.done.wait (%p1316_p7), %s160_s26, 512  }
  0x31   : > { %1239 = vsyncadd (%p1316_p7), %s160_s26, 4294966784  ;;  %v1259_v0 = vmov 0.0   ;;  %vm1260_vm0 = vmmov 0   ;;  %vm200_vm1 = vcmask 64512   ;;  %v199_v1 = vld [vmem:[%s1366_s28] sm:$0xff]  ;;  %v993_v3 = vld [vmem:[%s1366_s28 + $0x8] sm:$0xff] }
  0x32   : > { %1058 = vmatprep.subr.mxu0 %v1259_v0  ;;  %1060 = vmatprep.mubr.msk.f32.mxu0 %vm1260_vm0, %v1259_v0  ;;  %v195_v2 = vld [vmem:[%s1500_s0] sm:$0xff]  ;;  %v196_v4 = vld [vmem:[%s1500_s0 + $0x8] sm:$0xff]  ;;  %v197_v5 = vld [vmem:[%s1500_s0 + $0x10] sm:$0x1]  ;;  %s985_s8 = sshll.u32 %s976_s16, 2 }
  0x33   : > { %1069 = vmatprep.subr.mxu1 %v1259_v0  ;;  %1071 = vmatprep.mubr.msk.f32.mxu1 %vm1260_vm0, %v1259_v0  ;;  %v1003_v6 = vld [vmem:[%s1366_s28 + $0x10] sm:$0xff]  ;;  %v1013_v7 = vld [vmem:[%s1366_s28 + $0x18] sm:$0xff]  ;;  %v198_v8 = vld [vmem:[%s1502_s2] sm:$0xff]  ;;  %p189_p7 = scmp.lt.s32.totalorder %s985_s8, 7 }
  0x34   : > { %1059 = vmatpush3.msra.mxu0 %v199_v1  ;;  %1070 = vmatpush3.msra.mxu1 %v198_v8 }
  0x35   : > { %1061 = vmatmul.mubr.msk.f32.vlgmr.msra.gmra.mrb[0].mxu0 %vm200_vm1, %v195_v2  ;;  %1080 = vmatprep.subr.mxu0 %v1259_v0  ;;  %s1512_s8 = smov (!%p189_p7, %s985_s8), 7 }
  0x36   : > { %1081 = vmatpush3.msra.mxu0 %v993_v3  ;;  %1063 = vmatprep.mubr.msk.f32.mxu0 %vm1260_vm0, %v1259_v0  ;;  %s1146_s9 = smul.u32 24, %s1512_s8 }
  0x37   : > { %1102 = vmatprep.subr.mxu0 %v1259_v0  ;;  %1091 = vmatprep.subr.mxu1 %v1259_v0 }
  0x38   : > { %s1473_s12 = scalar_lea.vmem %s1503_s3, %s1146_s9 }
  0x39   : > { %1064 = vmatmul.mubr.msk.f32.gmra.mrb[2].mxu0 %vm200_vm1, %v196_v4 }
  0x3a   : > { %1066 = vmatprep.mubr.msk.f32.mxu0 %vm1260_vm0, %v1259_v0 }
  0x3d   : > { %1067 = vmatmul.mubr.msk.f32.gmra.mrb[4].mxu0 %vm200_vm1, %v197_v5 }
  0x3e   : > { %1082 = vmatprep.mubr.msk.f32.mxu0 %vm1260_vm0, %v1259_v0 }
  0x41   : > { %1083 = vmatmul.mubr.msk.f32.vlgmr.msra.gmra.mrb[6].mxu0 %vm200_vm1, %v195_v2 }
  0x42   : > { %1103 = vmatpush3.msra.mxu0 %v1003_v6  ;;  %1085 = vmatprep.mubr.msk.f32.mxu0 %vm1260_vm0, %v1259_v0 }
  0x43   : > { %1124 = vmatprep.subr.mxu0 %v1259_v0 }
  0x45   : > { %1086 = vmatmul.mubr.msk.f32.gmra.mrb[8].mxu0 %vm200_vm1, %v196_v4 }
  0x46   : > { %1088 = vmatprep.mubr.msk.f32.mxu0 %vm1260_vm0, %v1259_v0 }
  0x49   : > { %1089 = vmatmul.mubr.msk.f32.gmra.mrb[10].mxu0 %vm200_vm1, %v197_v5 }
  0x4a   : > { %1104 = vmatprep.mubr.msk.f32.mxu0 %vm1260_vm0, %v1259_v0 }
  0x4d   : > { %1105 = vmatmul.mubr.msk.f32.vlgmr.msra.gmra.mrb[12].mxu0 %vm200_vm1, %v195_v2 }
  0x4e   : > { %1125 = vmatpush3.msra.mxu0 %v1013_v7  ;;  %1107 = vmatprep.mubr.msk.f32.mxu0 %vm1260_vm0, %v1259_v0 }
  0x51   : > { %1108 = vmatmul.mubr.msk.f32.gmra.mrb[14].mxu0 %vm200_vm1, %v196_v4 }
  0x52   : > { %1110 = vmatprep.mubr.msk.f32.mxu0 %vm1260_vm0, %v1259_v0 }
  0x55   : > { %1111 = vmatmul.mubr.msk.f32.gmra.mrb[16].mxu0 %vm200_vm1, %v197_v5 }
  0x56   : > { %1126 = vmatprep.mubr.msk.f32.mxu0 %vm1260_vm0, %v1259_v0 }
  0x59   : > { %1127 = vmatmul.mubr.msk.f32.vlgmr.msra.gmra.mrb[18].mxu0 %vm200_vm1, %v195_v2 }
  0x5a   : > { %1129 = vmatprep.mubr.msk.f32.mxu0 %vm1260_vm0, %v1259_v0 }
  0x5d   : > { %1130 = vmatmul.mubr.msk.f32.gmra.mrb[20].mxu0 %vm200_vm1, %v196_v4 }
  0x5e   : > { %1132 = vmatprep.mubr.msk.f32.mxu0 %vm1260_vm0, %v1259_v0 }
  0x61   : > { %1133 = vmatmul.mubr.msk.f32.gmra.mrb[22].mxu0 %vm200_vm1, %v197_v5 }
 0x108   : > { %v276_v9 = vpop.f32.mrb[0].mxu0 }
 0x109   : > { %v1062_v10 = vpop.f32.mrb[1].mxu0  ;;  %1072 = vmatmul.mubr.msk.f32.vlgmr.msra.gmra.mrb[0].mxu1 %vm200_vm1, %v276_v9 }
 0x10a   : > { %1092 = vmatpush3.msra.mxu1 %v198_v8  ;;  %1074 = vmatprep.mubr.msk.f32.mxu1 %vm1260_vm0, %v1259_v0 }
 0x10b   : > { %1113 = vmatprep.subr.mxu1 %v1259_v0 }
 0x10c   : > { %v281_v11 = vpop.f32.mrb[2].mxu0 }
 0x10d   : > { %v1065_v12 = vpop.f32.mrb[3].mxu0  ;;  %1075 = vmatmul.mubr.msk.f32.gmra.mrb[2].mxu1 %vm200_vm1, %v281_v11 }
 0x10e   : > { %1077 = vmatprep.mubr.msk.f32.mxu1 %vm1260_vm0, %v1259_v0 }
 0x110   : > { %v286_v13 = vpop.f32.mrb[4].mxu0 }
 0x111   : > { %v1068_v14 = vpop.f32.mrb[5].mxu0  ;;  %1078 = vmatmul.mubr.msk.f32.gmra.mrb[4].mxu1 %vm200_vm1, %v286_v13 }
 0x112   : > { %1093 = vmatprep.mubr.msk.f32.mxu1 %vm1260_vm0, %v1259_v0 }
 0x114   : > { %v450_v15 = vpop.f32.mrb[6].mxu0 }
 0x115   : > { %v1084_v16 = vpop.f32.mrb[7].mxu0  ;;  %1094 = vmatmul.mubr.msk.f32.vlgmr.msra.gmra.mrb[6].mxu1 %vm200_vm1, %v450_v15 }
 0x116   : > { %1114 = vmatpush3.msra.mxu1 %v198_v8  ;;  %1096 = vmatprep.mubr.msk.f32.mxu1 %vm1260_vm0, %v1259_v0 }
 0x117   : > { %1135 = vmatprep.subr.mxu1 %v1259_v0 }
 0x118   : > { %v455_v17 = vpop.f32.mrb[8].mxu0 }
 0x119   : > { %v1087_v18 = vpop.f32.mrb[9].mxu0  ;;  %1097 = vmatmul.mubr.msk.f32.gmra.mrb[8].mxu1 %vm200_vm1, %v455_v17 }
 0x11a   : > { %1099 = vmatprep.mubr.msk.f32.mxu1 %vm1260_vm0, %v1259_v0 }
 0x11c   : > { %v460_v19 = vpop.f32.mrb[10].mxu0 }
 0x11d   : > { %v1090_v20 = vpop.f32.mrb[11].mxu0  ;;  %1100 = vmatmul.mubr.msk.f32.gmra.mrb[10].mxu1 %vm200_vm1, %v460_v19 }
 0x11e   : > { %1115 = vmatprep.mubr.msk.f32.mxu1 %vm1260_vm0, %v1259_v0 }
 0x120   : > { %v625_v21 = vpop.f32.mrb[12].mxu0 }
 0x121   : > { %v1106_v22 = vpop.f32.mrb[13].mxu0  ;;  %1116 = vmatmul.mubr.msk.f32.vlgmr.msra.gmra.mrb[12].mxu1 %vm200_vm1, %v625_v21 }
 0x122   : > { %1136 = vmatpush3.msra.mxu1 %v198_v8  ;;  %1118 = vmatprep.mubr.msk.f32.mxu1 %vm1260_vm0, %v1259_v0 }
 0x124   : > { %v630_v23 = vpop.f32.mrb[14].mxu0 }
 0x125   : > { %v1109_v24 = vpop.f32.mrb[15].mxu0  ;;  %1119 = vmatmul.mubr.msk.f32.gmra.mrb[14].mxu1 %vm200_vm1, %v630_v23 }
 0x126   : > { %1121 = vmatprep.mubr.msk.f32.mxu1 %vm1260_vm0, %v1259_v0 }
 0x128   : > { %v635_v25 = vpop.f32.mrb[16].mxu0 }
 0x129   : > { %v1112_v26 = vpop.f32.mrb[17].mxu0  ;;  %1122 = vmatmul.mubr.msk.f32.gmra.mrb[16].mxu1 %vm200_vm1, %v635_v25 }
 0x12a   : > { %1137 = vmatprep.mubr.msk.f32.mxu1 %vm1260_vm0, %v1259_v0 }
 0x12c   : > { %v800_v27 = vpop.f32.mrb[18].mxu0 }
 0x12d   : > { %v1128_v28 = vpop.f32.mrb[19].mxu0  ;;  %1138 = vmatmul.mubr.msk.f32.vlgmr.msra.gmra.mrb[18].mxu1 %vm200_vm1, %v800_v27 }
 0x12e   : > { %1140 = vmatprep.mubr.msk.f32.mxu1 %vm1260_vm0, %v1259_v0 }
 0x130   : > { %v805_v29 = vpop.f32.mrb[20].mxu0 }
 0x131   : > { %v1131_v30 = vpop.f32.mrb[21].mxu0  ;;  %1141 = vmatmul.mubr.msk.f32.gmra.mrb[20].mxu1 %vm200_vm1, %v805_v29 }
 0x132   : > { %1143 = vmatprep.mubr.msk.f32.mxu1 %vm1260_vm0, %v1259_v0 }
 0x134   : > { %v810_v31 = vpop.f32.mrb[22].mxu0 }
 0x135   : > { %v1134_v32 = vpop.f32.mrb[23].mxu0  ;;  %1144 = vmatmul.mubr.msk.f32.gmra.mrb[22].mxu1 %vm200_vm1, %v810_v31 }
 0x1dc   : > { %v365_v33 = vpop.f32.mrb[0].mxu1 }
 0x1dd   : > { %379 = vst [vmem:[%s1473_s12] sm:$0xff] %v365_v33  ;;  %v1073_v34 = vpop.f32.mrb[1].mxu1 }
 0x1e0   : > { %v370_v35 = vpop.f32.mrb[2].mxu1 }
 0x1e1   : > { %380 = vst [vmem:[%s1473_s12 + $0x8] sm:$0xff] %v370_v35  ;;  %v1076_v36 = vpop.f32.mrb[3].mxu1 }
 0x1e4   : > { %v375_v37 = vpop.f32.mrb[4].mxu1 }
 0x1e5   : > { %381 = vst [vmem:[%s1473_s12 + $0x10] sm:$0x1] %v375_v37  ;;  %v1079_v38 = vpop.f32.mrb[5].mxu1 }
 0x1e8   : > { %v539_v39 = vpop.f32.mrb[6].mxu1 }
 0x1e9   : > { %1000 = vst [vmem:[%s1473_s12 + $0x18] sm:$0xff] %v539_v39  ;;  %v1095_v40 = vpop.f32.mrb[7].mxu1 }
 0x1ec   : > { %v544_v41 = vpop.f32.mrb[8].mxu1 }
 0x1ed   : > { %1001 = vst [vmem:[%s1473_s12 + $0x20] sm:$0xff] %v544_v41  ;;  %v1098_v42 = vpop.f32.mrb[9].mxu1 }
 0x1f0   : > { %v549_v43 = vpop.f32.mrb[10].mxu1 }
 0x1f1   : > { %1002 = vst [vmem:[%s1473_s12 + $0x28] sm:$0x1] %v549_v43  ;;  %v1101_v44 = vpop.f32.mrb[11].mxu1 }
 0x1f4   : > { %v714_v45 = vpop.f32.mrb[12].mxu1 }
 0x1f5   : > { %1010 = vst [vmem:[%s1473_s12 + $0x30] sm:$0xff] %v714_v45  ;;  %v1117_v46 = vpop.f32.mrb[13].mxu1 }
 0x1f8   : > { %v719_v47 = vpop.f32.mrb[14].mxu1 }
 0x1f9   : > { %1011 = vst [vmem:[%s1473_s12 + $0x38] sm:$0xff] %v719_v47  ;;  %v1120_v48 = vpop.f32.mrb[15].mxu1 }
 0x1fc   : > { %v724_v49 = vpop.f32.mrb[16].mxu1 }
 0x1fd   : > { %1012 = vst [vmem:[%s1473_s12 + $0x40] sm:$0x1] %v724_v49  ;;  %v1123_v50 = vpop.f32.mrb[17].mxu1 }
 0x200   : > { %v889_v51 = vpop.f32.mrb[18].mxu1 }
 0x201   : > { %1020 = vst [vmem:[%s1473_s12 + $0x48] sm:$0xff] %v889_v51  ;;  %v1139_v52 = vpop.f32.mrb[19].mxu1 }
 0x204   : > { %v894_v53 = vpop.f32.mrb[20].mxu1 }
 0x205   : > { %1021 = vst [vmem:[%s1473_s12 + $0x50] sm:$0xff] %v894_v53  ;;  %v1142_v54 = vpop.f32.mrb[21].mxu1 }
 0x208   : > { %v899_v55 = vpop.f32.mrb[22].mxu1 }
 0x209   : > { %1022 = vst [vmem:[%s1473_s12 + $0x58] sm:$0x1] %v899_v55  ;;  %v1145_v56 = vpop.f32.mrb[23].mxu1 }
 0x20a PF: > { %p13_p8 = scmp.ge.s32.totalorder %s1301_s17, 4   ;;  %s1507_s12 = smov %s1246_s13 }
 0x20b   : > { %s1508_s13 = smov %s1250_s14  ;;  %s1509_s14 = smov %s1311_s20 }
 0x20c   : > { %s1510_s15 = smov %s1301_s17  ;;  %15 = sbr.rel (!%p13_p8) target bundleno = 3 (0x3), region = 78 }
 0x213   :  { %931 = vsyncpa [#allocation3], 1 }
 0x214   :  { %933 = vsyncpa [#allocation3 + $0x1], 1 }

</bundles_post_ra>
